<compile_context>
chip_gen: v6e
topology: v6e:2x2x1
jax: 0.10.0
libtpu: 0.0.40
codegen_flags: <defaults>
</compile_context>

<pallas_src>
import jax
import jax.numpy as jnp
from jax.experimental import pallas as pl
from jax.experimental.pallas import tpu as pltpu


# ----------------------------- kernels --------------------------------------


def _embed_kernel_vector(idx_ref,                      # VMEM (1, 3, tS) int32
                         fp_ref,                       # VMEM (1, tS, C) f32
                         w_ref,                        # VMEM (C, H) bf16 (rows 0..2 zero)
                         dtab_ref, rtab_ref, ctab_ref,  # VMEM (TABLE, H) (depth has bias folded in)
                         out_ref):                     # VMEM (1, tS, H)
    # Patch projection on the MXU: bf16 operands, f32 accumulation.  The index
    # channels hit the zero rows folded into W -> no in-kernel feature slice.
    x = fp_ref[0].astype(jnp.bfloat16)                                  # (tS, C)
    proj = jnp.dot(x, w_ref[...], preferred_element_type=jnp.float32)   # (tS, H)

    # Vectorized gather of all tS rows from each table (indices pre-clamped in
    # the wrapper, so every read is in-bounds).
    idx = idx_ref[0]                                                    # (3, tS)
    emb = (jnp.take(dtab_ref[...], idx[0], axis=0)
           + jnp.take(rtab_ref[...], idx[1], axis=0)
           + jnp.take(ctab_ref[...], idx[2], axis=0))                   # (tS, H)

    # Single lane-dense store of the final result.
    out_ref[0] = (proj + emb).astype(out_ref.dtype)


def _embed_kernel_loop(idx_ref,                        # SMEM (3, B*S) int32 (scalar prefetch)
                       fp_ref, w_ref,
                       dtab_ref, rtab_ref, ctab_ref,
                       out_ref,
                       emb_ref):                       # VMEM scratch (tS, H) f32
    # Conservative fallback: serial gather, but 8 sequence rows per iteration so
    # every store is a full-sublane unmasked (8, H) block.
    b = pl.program_id(0)
    st = pl.program_id(1)
    t_s = out_ref.shape[1]
    base = b * (pl.num_programs(1) * t_s) + st * t_s

    def gather8(g, carry):
        row0 = pl.multiple_of(g * 8, 8)
        rows = []
        for j in range(8):
            pos = base + row0 + j
            d_i = idx_ref[0, pos]
            r_i = idx_ref[1, pos]
            c_i = idx_ref[2, pos]
            rows.append(dtab_ref[pl.ds(d_i, 1), :]
                        + rtab_ref[pl.ds(r_i, 1), :]
                        + ctab_ref[pl.ds(c_i, 1), :])
        emb_ref[pl.ds(row0, 8), :] = jnp.concatenate(rows, axis=0).astype(emb_ref.dtype)
        return carry

    jax.lax.fori_loop(0, t_s // 8, gather8, 0, unroll=(t_s // 8) <= 4)

    x = fp_ref[0].astype(jnp.bfloat16)
    proj = jnp.dot(x, w_ref[...], preferred_element_type=jnp.float32)
    out_ref[0] = (proj + emb_ref[...]).astype(out_ref.dtype)


# ----------------------------- wrapper --------------------------------------


def pix2struct_vision_embeddings(flattened_patches, w, bias,
                                 depth_tab, row_tab, col_tab,
                                 *, seq_tile=512, gather_mode="vector",
                                 out_dtype=None, table_dtype=None):
    """flattened_patches: [B, S, 3+P]; w: [P, H]; bias: [H]; tables: [TABLE, H].
    Returns [B, S, H]."""
    B, S, C = flattened_patches.shape
    P = C - 3
    H = w.shape[1]
    assert w.shape[0] == P
    table = depth_tab.shape[0]
    out_dtype = flattened_patches.dtype if out_dtype is None else out_dtype

    # Sequence tile: full S when small, else a large (HBM-roofline) tile.
    if S <= seq_tile:
        t_s = S
    else:
        assert S % seq_tile == 0, "S must be divisible by the sequence tile"
        t_s = seq_tile
    n_s = S // t_s

    # Fold the 3 index channels into zero weight rows (one-time parameter op).
    w_full = jnp.concatenate([jnp.zeros((3, H), w.dtype), w], axis=0).astype(jnp.bfloat16)

    # Fold the linear bias into the depth table (each output row uses exactly
    # one depth row) and drop the bias operand entirely.
    depth_tab = (depth_tab + bias[None, :]).astype(depth_tab.dtype)
    if table_dtype is not None:
        depth_tab = depth_tab.astype(table_dtype)
        row_tab = row_tab.astype(table_dtype)
        col_tab = col_tab.astype(table_dtype)
    table_bytes = jnp.dtype(depth_tab.dtype).itemsize

    # Float-encoded integer indices -> int32 (truncation toward zero; exact for
    # non-negative indices < 2^24).  Clamp so OOB indices can't read bad VMEM.
    idx = jnp.clip(flattened_patches[:, :, :3].astype(jnp.int32), 0, table - 1)

    out_shape = jax.ShapeDtypeStruct((B, S, H), out_dtype)
    out_bytes = jnp.dtype(out_dtype).itemsize

    # VMEM budget: actual buffer footprint (inputs/outputs double-buffered,
    # constant operands single-buffered on the vector path), capped against the
    # device VMEM capacity minus headroom for compiler scratch.
    const_buf = 1 if gather_mode == "vector" else 2
    footprint = (2 * t_s * C * 4                               # patch tiles
                 + 2 * 3 * t_s * 4                             # index tiles
                 + 2 * t_s * H * out_bytes                     # output tiles
                 + const_buf * C * H * 2                       # projection weight (bf16)
                 + const_buf * 3 * table * H * table_bytes     # embedding tables
                 + t_s * H * 4)                                # loop-mode scratch
    try:
        vmem_cap = pltpu.get_tpu_info().vmem_capacity_bytes
    except Exception:
        vmem_cap = 64 * 2**20                                  # conservative (v7x per-core)
    vmem_limit = int(min(max(footprint + (4 << 20), 32 << 20), vmem_cap - (12 << 20)))

    cparams = pltpu.CompilerParams(
        dimension_semantics=("parallel", "parallel"),
        vmem_limit_bytes=vmem_limit,
    )

    if gather_mode == "vector":
        const_map = lambda b, s: (0, 0)
        const_kw = dict(pipeline_mode=pl.Buffered(1))          # single-buffer resident operands
        grid_spec = pltpu.PrefetchScalarGridSpec(
            num_scalar_prefetch=0,
            grid=(B, n_s),
            in_specs=[
                pl.BlockSpec((1, 3, t_s), lambda b, s: (b, 0, s)),
                pl.BlockSpec((1, t_s, C), lambda b, s: (b, s, 0)),
                pl.BlockSpec((C, H), const_map, **const_kw),
                pl.BlockSpec((table, H), const_map, **const_kw),
                pl.BlockSpec((table, H), const_map, **const_kw),
                pl.BlockSpec((table, H), const_map, **const_kw),
            ],
            out_specs=pl.BlockSpec((1, t_s, H), lambda b, s: (b, s, 0)),
        )
        idx_v = jnp.transpose(idx, (0, 2, 1))                  # (B, 3, S), S on the lane axis
        return pl.pallas_call(
            _embed_kernel_vector, out_shape=out_shape,
            grid_spec=grid_spec, compiler_params=cparams,
        )(idx_v, flattened_patches, w_full, depth_tab, row_tab, col_tab)

    # ---- fallback path: SMEM indices + 8-rows-per-iteration gather loop ----
    assert t_s % 8 == 0, "loop gather path requires the sequence tile % 8 == 0"
    idx_s = jnp.transpose(idx, (2, 0, 1)).reshape(3, B * S)    # (3, B*S): no 3->8 sublane padding
    grid_spec = pltpu.PrefetchScalarGridSpec(
        num_scalar_prefetch=1,
        grid=(B, n_s),
        in_specs=[
            pl.BlockSpec((1, t_s, C), lambda b, s, idx: (b, s, 0)),
            pl.BlockSpec((C, H), lambda b, s, idx: (0, 0)),
            pl.BlockSpec((table, H), lambda b, s, idx: (0, 0)),
            pl.BlockSpec((table, H), lambda b, s, idx: (0, 0)),
            pl.BlockSpec((table, H), lambda b, s, idx: (0, 0)),
        ],
        out_specs=pl.BlockSpec((1, t_s, H), lambda b, s, idx: (b, s, 0)),
        scratch_shapes=[pltpu.VMEM((t_s, H), jnp.float32)],
    )
    return pl.pallas_call(
        _embed_kernel_loop, out_shape=out_shape,
        grid_spec=grid_spec, compiler_params=cparams,
    )(idx_s, flattened_patches, w_full, depth_tab, row_tab, col_tab)


# ----------------------------- reference ------------------------------------


def _reference(flattened_patches, w, bias, depth_tab, row_tab, col_tab):
    idx = flattened_patches[:, :, :3].astype(jnp.int32)
    patches = flattened_patches[:, :, 3:]
    proj = jnp.einsum("bsp,ph->bsh", patches, w) + bias
    return (proj
            + depth_tab[idx[..., 0]]
            + row_tab[idx[..., 1]]
            + col_tab[idx[..., 2]])


if __name__ == "__main__":
    # Small config: batch=2, seq=8, embedding tables of 16 rows,
    # patch_embed_hidden_size=16, hidden_size=128 (lane-dense output).
    B, S, TABLE, P, H = 2, 8, 16, 16, 128
    C = 3 + P

    key = jax.random.PRNGKey(0)
    k_feat, k_idx, k_w, k_b, k_d, k_r, k_c = jax.random.split(key, 7)

    w = jax.random.normal(k_w, (P, H), dtype=jnp.float32) * 0.02
    bias = jax.random.normal(k_b, (H,), dtype=jnp.float32) * 0.02
    depth_tab = jax.random.normal(k_d, (TABLE, H), dtype=jnp.float32) * 0.02
    row_tab = jax.random.normal(k_r, (TABLE, H), dtype=jnp.float32) * 0.02
    col_tab = jax.random.normal(k_c, (TABLE, H), dtype=jnp.float32) * 0.02

    # Input: first 3 channels are integer-valued position indices in [0, TABLE).
    feats = jax.random.normal(k_feat, (B, S, P), dtype=jnp.float32)
    pos_idx = jax.random.randint(k_idx, (B, S, 3), 0, TABLE).astype(jnp.float32)
    flattened_patches = jnp.concatenate([pos_idx, feats], axis=-1)       # (B, S, 3+P)

    try:
        out = jax.block_until_ready(
            pix2struct_vision_embeddings(flattened_patches, w, bias,
                                         depth_tab, row_tab, col_tab))
    except Exception:
        # Older jax builds without the vectorized in-kernel gather lowering:
        # fall back to the SMEM + 8-rows-per-iteration gather path.
        out = jax.block_until_ready(
            pix2struct_vision_embeddings(flattened_patches, w, bias,
                                         depth_tab, row_tab, col_tab,
                                         gather_mode="loop"))

    ref = _reference(flattened_patches, w, bias, depth_tab, row_tab, col_tab)
    assert out.shape == (B, S, H)
    # bf16 matmul operands with f32 accumulation -> relaxed tolerance vs f32 reference.
    assert jnp.allclose(out, ref, atol=1e-2, rtol=1e-2), "mismatch vs reference"

    print("KERNEL_OK")
</pallas_src>

<mosaic_0001>
module attributes {stable_mosaic.version = 11 : i64} {
  func.func @_embed_kernel_loop(%arg0: i32, %arg1: i32, %arg2: memref<3x16xi32, #tpu.memory_space<smem>>, %arg3: memref<1x8x19xf32, #tpu.memory_space<vmem>>, %arg4: memref<19x128xbf16, #tpu.memory_space<vmem>>, %arg5: memref<16x128xf32, #tpu.memory_space<vmem>>, %arg6: memref<16x128xf32, #tpu.memory_space<vmem>>, %arg7: memref<16x128xf32, #tpu.memory_space<vmem>>, %arg8: memref<1x8x128xf32, #tpu.memory_space<vmem>>, %arg9: memref<8x128xf32, #tpu.memory_space<vmem>>) attributes {dimension_semantics = [#tpu.dimension_semantics<parallel>, #tpu.dimension_semantics<parallel>], iteration_bounds = array<i64: 2, 1>, scalar_prefetch = 1 : i64, scratch_operands = 1 : i64, tpu.core_type = #tpu.core_type<tc>, window_params = [{transform_indices = @transform_0, window_bounds = array<i64: 1, 8, 19>}, {pipeline_mode = #tpu.pipeline_mode<synchronous>, transform_indices = @transform_1, window_bounds = array<i64: 19, 128>}, {pipeline_mode = #tpu.pipeline_mode<synchronous>, transform_indices = @transform_2, window_bounds = array<i64: 16, 128>}, {pipeline_mode = #tpu.pipeline_mode<synchronous>, transform_indices = @transform_3, window_bounds = array<i64: 16, 128>}, {pipeline_mode = #tpu.pipeline_mode<synchronous>, transform_indices = @transform_4, window_bounds = array<i64: 16, 128>}, {transform_indices = @transform_5, window_bounds = array<i64: 1, 8, 128>}]} {
    %c8_i32 = arith.constant 8 : i32
    %0 = arith.muli %arg0, %c8_i32 : i32
    %c8_i32_0 = arith.constant 8 : i32
    %1 = arith.muli %arg1, %c8_i32_0 : i32
    %2 = arith.addi %0, %1 : i32
    %c0_i32 = arith.constant 0 : i32
    %c8_i32_1 = arith.constant 8 : i32
    %3 = arith.muli %c0_i32, %c8_i32_1 : i32
    %4 = tpu.assume_multiple %3, 8 : i32
    %5 = arith.addi %2, %4 : i32
    %c0_i32_2 = arith.constant 0 : i32
    %6 = arith.addi %5, %c0_i32_2 : i32
    %c0 = arith.constant 0 : index
    %7 = arith.index_cast %6 : i32 to index
    %8 = memref.load %arg2[%c0, %7] : memref<3x16xi32, #tpu.memory_space<smem>>
    %c1 = arith.constant 1 : index
    %9 = arith.index_cast %6 : i32 to index
    %10 = memref.load %arg2[%c1, %9] : memref<3x16xi32, #tpu.memory_space<smem>>
    %c2 = arith.constant 2 : index
    %11 = arith.index_cast %6 : i32 to index
    %12 = memref.load %arg2[%c2, %11] : memref<3x16xi32, #tpu.memory_space<smem>>
    %13 = arith.index_cast %8 : i32 to index
    %c0_3 = arith.constant 0 : index
    %14 = vector.load %arg5[%13, %c0_3] : memref<16x128xf32, #tpu.memory_space<vmem>>, vector<1x128xf32>
    %15 = arith.index_cast %10 : i32 to index
    %c0_4 = arith.constant 0 : index
    %16 = vector.load %arg6[%15, %c0_4] : memref<16x128xf32, #tpu.memory_space<vmem>>, vector<1x128xf32>
    %17 = arith.addf %14, %16 : vector<1x128xf32>
    %18 = arith.index_cast %12 : i32 to index
    %c0_5 = arith.constant 0 : index
    %19 = vector.load %arg7[%18, %c0_5] : memref<16x128xf32, #tpu.memory_space<vmem>>, vector<1x128xf32>
    %20 = arith.addf %17, %19 : vector<1x128xf32>
    %21 = arith.addi %2, %4 : i32
    %c1_i32 = arith.constant 1 : i32
    %22 = arith.addi %21, %c1_i32 : i32
    %c0_6 = arith.constant 0 : index
    %23 = arith.index_cast %22 : i32 to index
    %24 = memref.load %arg2[%c0_6, %23] : memref<3x16xi32, #tpu.memory_space<smem>>
    %c1_7 = arith.constant 1 : index
    %25 = arith.index_cast %22 : i32 to index
    %26 = memref.load %arg2[%c1_7, %25] : memref<3x16xi32, #tpu.memory_space<smem>>
    %c2_8 = arith.constant 2 : index
    %27 = arith.index_cast %22 : i32 to index
    %28 = memref.load %arg2[%c2_8, %27] : memref<3x16xi32, #tpu.memory_space<smem>>
    %29 = arith.index_cast %24 : i32 to index
    %c0_9 = arith.constant 0 : index
    %30 = vector.load %arg5[%29, %c0_9] : memref<16x128xf32, #tpu.memory_space<vmem>>, vector<1x128xf32>
    %31 = arith.index_cast %26 : i32 to index
    %c0_10 = arith.constant 0 : index
    %32 = vector.load %arg6[%31, %c0_10] : memref<16x128xf32, #tpu.memory_space<vmem>>, vector<1x128xf32>
    %33 = arith.addf %30, %32 : vector<1x128xf32>
    %34 = arith.index_cast %28 : i32 to index
    %c0_11 = arith.constant 0 : index
    %35 = vector.load %arg7[%34, %c0_11] : memref<16x128xf32, #tpu.memory_space<vmem>>, vector<1x128xf32>
    %36 = arith.addf %33, %35 : vector<1x128xf32>
    %37 = arith.addi %2, %4 : i32
    %c2_i32 = arith.constant 2 : i32
    %38 = arith.addi %37, %c2_i32 : i32
    %c0_12 = arith.constant 0 : index
    %39 = arith.index_cast %38 : i32 to index
    %40 = memref.load %arg2[%c0_12, %39] : memref<3x16xi32, #tpu.memory_space<smem>>
    %c1_13 = arith.constant 1 : index
    %41 = arith.index_cast %38 : i32 to index
    %42 = memref.load %arg2[%c1_13, %41] : memref<3x16xi32, #tpu.memory_space<smem>>
    %c2_14 = arith.constant 2 : index
    %43 = arith.index_cast %38 : i32 to index
    %44 = memref.load %arg2[%c2_14, %43] : memref<3x16xi32, #tpu.memory_space<smem>>
    %45 = arith.index_cast %40 : i32 to index
    %c0_15 = arith.constant 0 : index
    %46 = vector.load %arg5[%45, %c0_15] : memref<16x128xf32, #tpu.memory_space<vmem>>, vector<1x128xf32>
    %47 = arith.index_cast %42 : i32 to index
    %c0_16 = arith.constant 0 : index
    %48 = vector.load %arg6[%47, %c0_16] : memref<16x128xf32, #tpu.memory_space<vmem>>, vector<1x128xf32>
    %49 = arith.addf %46, %48 : vector<1x128xf32>
    %50 = arith.index_cast %44 : i32 to index
    %c0_17 = arith.constant 0 : index
    %51 = vector.load %arg7[%50, %c0_17] : memref<16x128xf32, #tpu.memory_space<vmem>>, vector<1x128xf32>
    %52 = arith.addf %49, %51 : vector<1x128xf32>
    %53 = arith.addi %2, %4 : i32
    %c3_i32 = arith.constant 3 : i32
    %54 = arith.addi %53, %c3_i32 : i32
    %c0_18 = arith.constant 0 : index
    %55 = arith.index_cast %54 : i32 to index
    %56 = memref.load %arg2[%c0_18, %55] : memref<3x16xi32, #tpu.memory_space<smem>>
    %c1_19 = arith.constant 1 : index
    %57 = arith.index_cast %54 : i32 to index
    %58 = memref.load %arg2[%c1_19, %57] : memref<3x16xi32, #tpu.memory_space<smem>>
    %c2_20 = arith.constant 2 : index
    %59 = arith.index_cast %54 : i32 to index
    %60 = memref.load %arg2[%c2_20, %59] : memref<3x16xi32, #tpu.memory_space<smem>>
    %61 = arith.index_cast %56 : i32 to index
    %c0_21 = arith.constant 0 : index
    %62 = vector.load %arg5[%61, %c0_21] : memref<16x128xf32, #tpu.memory_space<vmem>>, vector<1x128xf32>
    %63 = arith.index_cast %58 : i32 to index
    %c0_22 = arith.constant 0 : index
    %64 = vector.load %arg6[%63, %c0_22] : memref<16x128xf32, #tpu.memory_space<vmem>>, vector<1x128xf32>
    %65 = arith.addf %62, %64 : vector<1x128xf32>
    %66 = arith.index_cast %60 : i32 to index
    %c0_23 = arith.constant 0 : index
    %67 = vector.load %arg7[%66, %c0_23] : memref<16x128xf32, #tpu.memory_space<vmem>>, vector<1x128xf32>
    %68 = arith.addf %65, %67 : vector<1x128xf32>
    %69 = arith.addi %2, %4 : i32
    %c4_i32 = arith.constant 4 : i32
    %70 = arith.addi %69, %c4_i32 : i32
    %c0_24 = arith.constant 0 : index
    %71 = arith.index_cast %70 : i32 to index
    %72 = memref.load %arg2[%c0_24, %71] : memref<3x16xi32, #tpu.memory_space<smem>>
    %c1_25 = arith.constant 1 : index
    %73 = arith.index_cast %70 : i32 to index
    %74 = memref.load %arg2[%c1_25, %73] : memref<3x16xi32, #tpu.memory_space<smem>>
    %c2_26 = arith.constant 2 : index
    %75 = arith.index_cast %70 : i32 to index
    %76 = memref.load %arg2[%c2_26, %75] : memref<3x16xi32, #tpu.memory_space<smem>>
    %77 = arith.index_cast %72 : i32 to index
    %c0_27 = arith.constant 0 : index
    %78 = vector.load %arg5[%77, %c0_27] : memref<16x128xf32, #tpu.memory_space<vmem>>, vector<1x128xf32>
    %79 = arith.index_cast %74 : i32 to index
    %c0_28 = arith.constant 0 : index
    %80 = vector.load %arg6[%79, %c0_28] : memref<16x128xf32, #tpu.memory_space<vmem>>, vector<1x128xf32>
    %81 = arith.addf %78, %80 : vector<1x128xf32>
    %82 = arith.index_cast %76 : i32 to index
    %c0_29 = arith.constant 0 : index
    %83 = vector.load %arg7[%82, %c0_29] : memref<16x128xf32, #tpu.memory_space<vmem>>, vector<1x128xf32>
    %84 = arith.addf %81, %83 : vector<1x128xf32>
    %85 = arith.addi %2, %4 : i32
    %c5_i32 = arith.constant 5 : i32
    %86 = arith.addi %85, %c5_i32 : i32
    %c0_30 = arith.constant 0 : index
    %87 = arith.index_cast %86 : i32 to index
    %88 = memref.load %arg2[%c0_30, %87] : memref<3x16xi32, #tpu.memory_space<smem>>
    %c1_31 = arith.constant 1 : index
    %89 = arith.index_cast %86 : i32 to index
    %90 = memref.load %arg2[%c1_31, %89] : memref<3x16xi32, #tpu.memory_space<smem>>
    %c2_32 = arith.constant 2 : index
    %91 = arith.index_cast %86 : i32 to index
    %92 = memref.load %arg2[%c2_32, %91] : memref<3x16xi32, #tpu.memory_space<smem>>
    %93 = arith.index_cast %88 : i32 to index
    %c0_33 = arith.constant 0 : index
    %94 = vector.load %arg5[%93, %c0_33] : memref<16x128xf32, #tpu.memory_space<vmem>>, vector<1x128xf32>
    %95 = arith.index_cast %90 : i32 to index
    %c0_34 = arith.constant 0 : index
    %96 = vector.load %arg6[%95, %c0_34] : memref<16x128xf32, #tpu.memory_space<vmem>>, vector<1x128xf32>
    %97 = arith.addf %94, %96 : vector<1x128xf32>
    %98 = arith.index_cast %92 : i32 to index
    %c0_35 = arith.constant 0 : index
    %99 = vector.load %arg7[%98, %c0_35] : memref<16x128xf32, #tpu.memory_space<vmem>>, vector<1x128xf32>
    %100 = arith.addf %97, %99 : vector<1x128xf32>
    %101 = arith.addi %2, %4 : i32
    %c6_i32 = arith.constant 6 : i32
    %102 = arith.addi %101, %c6_i32 : i32
    %c0_36 = arith.constant 0 : index
    %103 = arith.index_cast %102 : i32 to index
    %104 = memref.load %arg2[%c0_36, %103] : memref<3x16xi32, #tpu.memory_space<smem>>
    %c1_37 = arith.constant 1 : index
    %105 = arith.index_cast %102 : i32 to index
    %106 = memref.load %arg2[%c1_37, %105] : memref<3x16xi32, #tpu.memory_space<smem>>
    %c2_38 = arith.constant 2 : index
    %107 = arith.index_cast %102 : i32 to index
    %108 = memref.load %arg2[%c2_38, %107] : memref<3x16xi32, #tpu.memory_space<smem>>
    %109 = arith.index_cast %104 : i32 to index
    %c0_39 = arith.constant 0 : index
    %110 = vector.load %arg5[%109, %c0_39] : memref<16x128xf32, #tpu.memory_space<vmem>>, vector<1x128xf32>
    %111 = arith.index_cast %106 : i32 to index
    %c0_40 = arith.constant 0 : index
    %112 = vector.load %arg6[%111, %c0_40] : memref<16x128xf32, #tpu.memory_space<vmem>>, vector<1x128xf32>
    %113 = arith.addf %110, %112 : vector<1x128xf32>
    %114 = arith.index_cast %108 : i32 to index
    %c0_41 = arith.constant 0 : index
    %115 = vector.load %arg7[%114, %c0_41] : memref<16x128xf32, #tpu.memory_space<vmem>>, vector<1x128xf32>
    %116 = arith.addf %113, %115 : vector<1x128xf32>
    %117 = arith.addi %2, %4 : i32
    %c7_i32 = arith.constant 7 : i32
    %118 = arith.addi %117, %c7_i32 : i32
    %c0_42 = arith.constant 0 : index
    %119 = arith.index_cast %118 : i32 to index
    %120 = memref.load %arg2[%c0_42, %119] : memref<3x16xi32, #tpu.memory_space<smem>>
    %c1_43 = arith.constant 1 : index
    %121 = arith.index_cast %118 : i32 to index
    %122 = memref.load %arg2[%c1_43, %121] : memref<3x16xi32, #tpu.memory_space<smem>>
    %c2_44 = arith.constant 2 : index
    %123 = arith.index_cast %118 : i32 to index
    %124 = memref.load %arg2[%c2_44, %123] : memref<3x16xi32, #tpu.memory_space<smem>>
    %125 = arith.index_cast %120 : i32 to index
    %c0_45 = arith.constant 0 : index
    %126 = vector.load %arg5[%125, %c0_45] : memref<16x128xf32, #tpu.memory_space<vmem>>, vector<1x128xf32>
    %127 = arith.index_cast %122 : i32 to index
    %c0_46 = arith.constant 0 : index
    %128 = vector.load %arg6[%127, %c0_46] : memref<16x128xf32, #tpu.memory_space<vmem>>, vector<1x128xf32>
    %129 = arith.addf %126, %128 : vector<1x128xf32>
    %130 = arith.index_cast %124 : i32 to index
    %c0_47 = arith.constant 0 : index
    %131 = vector.load %arg7[%130, %c0_47] : memref<16x128xf32, #tpu.memory_space<vmem>>, vector<1x128xf32>
    %132 = arith.addf %129, %131 : vector<1x128xf32>
    %133 = tpu.concatenate %20, %36, %52, %68, %84, %100, %116, %132 in 0 : vector<1x128xf32>, vector<1x128xf32>, vector<1x128xf32>, vector<1x128xf32>, vector<1x128xf32>, vector<1x128xf32>, vector<1x128xf32>, vector<1x128xf32> -> vector<8x128xf32>
    %134 = arith.index_cast %4 : i32 to index
    %c0_48 = arith.constant 0 : index
    %135 = vector.load %arg9[%134, %c0_48] : memref<8x128xf32, #tpu.memory_space<vmem>>, vector<8x128xf32>
    tpu.vector_store %arg9[%134, %c0_48], %133 {strides = array<i32>} : memref<8x128xf32, #tpu.memory_space<vmem>>, vector<8x128xf32>,
    %c1_i32_49 = arith.constant 1 : i32
    %c0_50 = arith.constant 0 : index
    %c0_51 = arith.constant 0 : index
    %c0_52 = arith.constant 0 : index
    %136 = vector.load %arg3[%c0_50, %c0_51, %c0_52] : memref<1x8x19xf32, #tpu.memory_space<vmem>>, vector<1x8x19xf32>
    %137 = vector.shape_cast %136 : vector<1x8x19xf32> to vector<8x19xf32>
    %138 = arith.truncf %137 : vector<8x19xf32> to vector<8x19xbf16>
    %c0_53 = arith.constant 0 : index
    %c0_54 = arith.constant 0 : index
    %139 = vector.load %arg4[%c0_53, %c0_54] : memref<19x128xbf16, #tpu.memory_space<vmem>>, vector<19x128xbf16>
    %cst = arith.constant dense<0.000000e+00> : vector<8x128xf32>
    %140 = tpu.matmul %138, %139, %cst {dimension_numbers = #tpu.dot_dimension_numbers<[1], [0], [0], [1], [0, 0, 1, 1], [], []>} : vector<8x19xbf16>, vector<19x128xbf16>, vector<8x128xf32> -> vector<8x128xf32>
    %c0_55 = arith.constant 0 : index
    %c0_56 = arith.constant 0 : index
    %141 = vector.load %arg9[%c0_55, %c0_56] : memref<8x128xf32, #tpu.memory_space<vmem>>, vector<8x128xf32>
    %142 = arith.addf %140, %141 : vector<8x128xf32>
    %c0_57 = arith.constant 0 : index
    %c0_58 = arith.constant 0 : index
    %c0_59 = arith.constant 0 : index
    %143 = vector.load %arg8[%c0_57, %c0_58, %c0_59] : memref<1x8x128xf32, #tpu.memory_space<vmem>>, vector<1x8x128xf32>
    %144 = vector.shape_cast %143 : vector<1x8x128xf32> to vector<8x128xf32>
    %145 = vector.shape_cast %142 : vector<8x128xf32> to vector<1x8x128xf32>
    tpu.vector_store %arg8[%c0_57, %c0_58, %c0_59], %145 {strides = array<i32>} : memref<1x8x128xf32, #tpu.memory_space<vmem>>, vector<1x8x128xf32>,
    return
  }
  func.func @transform_0(%arg0: i32, %arg1: i32, %arg2: memref<3x16xi32, #tpu.memory_space<smem>>) -> (i32, i32, i32) {
    %c0_i32 = arith.constant 0 : i32
    %c0_i32_0 = arith.constant 0 : i32
    return %arg0, %arg1, %c0_i32 : i32, i32, i32
  }
  func.func @transform_1(%arg0: i32, %arg1: i32, %arg2: memref<3x16xi32, #tpu.memory_space<smem>>) -> (i32, i32) {
    %c0_i32 = arith.constant 0 : i32
    %c0_i32_0 = arith.constant 0 : i32
    %c0_i32_1 = arith.constant 0 : i32
    return %c0_i32, %c0_i32_0 : i32, i32
  }
  func.func @transform_2(%arg0: i32, %arg1: i32, %arg2: memref<3x16xi32, #tpu.memory_space<smem>>) -> (i32, i32) {
    %c0_i32 = arith.constant 0 : i32
    %c0_i32_0 = arith.constant 0 : i32
    %c0_i32_1 = arith.constant 0 : i32
    return %c0_i32, %c0_i32_0 : i32, i32
  }
  func.func @transform_3(%arg0: i32, %arg1: i32, %arg2: memref<3x16xi32, #tpu.memory_space<smem>>) -> (i32, i32) {
    %c0_i32 = arith.constant 0 : i32
    %c0_i32_0 = arith.constant 0 : i32
    %c0_i32_1 = arith.constant 0 : i32
    return %c0_i32, %c0_i32_0 : i32, i32
  }
  func.func @transform_4(%arg0: i32, %arg1: i32, %arg2: memref<3x16xi32, #tpu.memory_space<smem>>) -> (i32, i32) {
    %c0_i32 = arith.constant 0 : i32
    %c0_i32_0 = arith.constant 0 : i32
    %c0_i32_1 = arith.constant 0 : i32
    return %c0_i32, %c0_i32_0 : i32, i32
  }
  func.func @transform_5(%arg0: i32, %arg1: i32, %arg2: memref<3x16xi32, #tpu.memory_space<smem>>) -> (i32, i32, i32) {
    %c0_i32 = arith.constant 0 : i32
    %c0_i32_0 = arith.constant 0 : i32
    return %arg0, %arg1, %c0_i32 : i32, i32, i32
  }
}

</mosaic_0001>

<bundles_post_ra>
// kernel: tpu_custom_call.1
= control target key start
LH: loop header
LB: loop body
LE: loop exit
PB: predicated region body
PF: predicated region fallthrough
CT: control target
= control target key end

     0   :  { %s1187_s21 = smov [#allocation4]   ;;  %s1541_s0 = inlined_call_operand.hbm [shape: s32[3,16], index: 0, kind: input, shape index: {}]   ;;  %s1542_s1 = inlined_call_operand.hbm [shape: f32[2,8,19], index: 1, kind: input, shape index: {}]   ;;  %s1543_s2 = inlined_call_operand.hbm [shape: bf16[19,128], index: 2, kind: input, shape index: {}]   ;;  %s1544_s3 = inlined_call_operand.hbm [shape: f32[16,128], index: 3, kind: input, shape index: {}]   ;;  %s1545_s4 = inlined_call_operand.hbm [shape: f32[16,128], index: 4, kind: input, shape index: {}]   ;;  %s1546_s5 = inlined_call_operand.hbm [shape: f32[16,128], index: 5, kind: input, shape index: {}]   ;;  %s1547_s6 = inlined_call_operand.hbm [shape: f32[2,8,128], index: 6, kind: output, shape index: {}]  }
   0x1   :  { %1558 = sst [smem:[#allocation28_spill]] %s1542_s1 }
   0x2   :  { %1559 = sst [smem:[#allocation29_spill]] %s1543_s2 }
   0x3   :  { %1560 = sst [smem:[#allocation30_spill]] %s1544_s3 }
   0x4   :  { %1561 = sst [smem:[#allocation31_spill]] %s1545_s4 }
   0x5   :  { %1562 = sst [smem:[#allocation32_spill]] %s1546_s5 }
   0x6   :  { %1563 = sst [smem:[#allocation33_spill]] %s1547_s6 }
   0x7   :  { %12 = dma.hbm_to_smem %s1541_s0, 64, %s1187_s21, [#allocation3] }
   0x8   :  { %1145 = dma.done.wait [#allocation3], 64 }
   0x9   :  { %1146 = vsyncadd [#allocation3], 4294967232 }
   0xa   :  { %14 = sfence }
   0xb   :  { %15 = vsyncpa [#allocation6], 0 }
   0xc   :  { %17 = vsyncpa [#allocation6 + $0x1], 0 }
   0xd   :  { %18 = vsyncpa [#allocation9], 0 }
   0xe   :  { %19 = vsyncpa [#allocation12], 0 }
   0xf   :  { %20 = vsyncpa [#allocation7], 0 }
  0x10   :  { %22 = vsyncpa [#allocation7 + $0x1], 0  ;;  %s1239_s24 = smov 0   ;;  %s1241_s25 = smov 0  }
  0x11   :  { %s1243_s26 = smov 0   ;;  %s1245_s27 = smov 0  }
  0x12   :  { %s1247_s28 = smov 0   ;;  %s1249_s0 = smov 0  }
  0x13 LB: > { %1564 = sst [smem:[#allocation20_spill]] %s1165_s24  ;;  %s758_s29 = sadd.s32 4294967295, %s1185_s0   ;;  %s1185_s0 = sphi %s1249_s0, %s28_s0   ;;  %s1181_s28 = sphi %s1247_s28, %s1597_s28   ;;  %s1177_s27 = sphi %s1245_s27, %s1596_s27   ;;  %s1173_s26 = sphi %s1243_s26, %s1595_s26   ;;  %s1169_s25 = sphi %s1241_s25, %s1594_s25   ;;  %s1165_s24 = sphi %s1239_s24, %s1593_s24  }
  0x14   : > { %1565 = sst [smem:[#allocation21_spill]] %s1169_s25  ;;  %p760_p0 = scmp.ge.s32.totalorder %s1185_s0, 1 }
  0x15   : > { %1566 = sst [smem:[#allocation22_spill]] %s1173_s26  ;;  %p1273_p1 = scmp.eq.s32.totalorder %s758_s29, 0 }
  0x16   : > { %1567 = sst [smem:[#allocation23_spill]] %s1181_s28  ;;  %p185_p2 = scmp.lt.s32.totalorder %s1185_s0, 3 }
  0x17   : > { %1568 = sst [smem:[#allocation24_spill]] %s1185_s0  ;;  %s1188_s8 = smov [#allocation8]  }
  0x18   : > { %p1278_p3 = pnand %p760_p0, %p185_p2  ;;  %s197_s9 = sshll.u32 %s1188_s8, 4  ;;  %s198_s9 = int_to_ptr.vmem [resolvable:$true] %s197_s9 }
  0x19   : > { %s1189_s11 = smov [#allocation11]   ;;  %s974_s13 = scalar_lea.vmem %s198_s9, 192 }
  0x1a   : > { %p862_p4 = pneg %p1278_p3  ;;  %s223_s12 = sshll.u32 %s1189_s11, 4  ;;  %s224_s12 = int_to_ptr.vmem [resolvable:$true] %s223_s12 }
  0x1b   : > { %p975_p8 = scmp.ne.s32.totalorder %s198_s9, %s974_s13  ;;  %p982_p11 = scmp.lt.s32.totalorder %s198_s9, %s198_s9 }
  0x1c   : > { %p1287_p6 = pnand %p862_p4, %p1273_p1  ;;  %p983_p12 = scmp.lt.s32.totalorder %s974_s13, %s974_s13 }
  0x1e   : > { %p965_p7 = pneg %p1287_p6  ;;  %p984_p13 = por %p983_p12, %p982_p11 }
  0x20   : > { %p977_p9 = pnand %p975_p8, %p965_p7 }
  0x22   : > { %p978_p10 = pneg %p977_p9 }
  0x24   : > { %p985_p0 = pnand %p984_p13, %p978_p10 }
  0x26   : > { %988 = shalt.err (!%p985_p0)
}
  0x27   : > { %s1190_s14 = smov 64   ;;  %s1191_s15 = smov 4  }
  0x28   : > { %s1572_s2 = sld [smem:[#allocation29_spill]]  ;;  %s1192_s18 = smov [#allocation10]  }
  0x29   : > { %s210_s19 = sshll.u32 %s1192_s18, 4  ;;  %s1000_s20 = scalar_lea.vmem %s224_s12, 256  ;;  %s211_s19 = int_to_ptr.vmem [resolvable:$true] %s210_s19 }
  0x2a   : > { %p1001_p2 = scmp.ne.s32.totalorder %s224_s12, %s1000_s20  ;;  %p1008_p9 = scmp.lt.s32.totalorder %s224_s12, %s224_s12 }
  0x2b   : > { %p1009_p10 = scmp.lt.s32.totalorder %s1000_s20, %s1000_s20 }
  0x2c   : > { %p1003_p4 = pnand %p1001_p2, %p965_p7 }
  0x2d   : > { %p1010_p11 = por %p1009_p10, %p1008_p9 }
  0x2e   : > { %865 = dma.hbm_to_vmem [thread:$0]  (!%p1287_p6), %s1572_s2, 192, %s198_s9, [#allocation9], %s1190_s14, %s1190_s14, %s1191_s15  }
  0x2f   : > { %p1004_p8 = pneg %p1003_p4 }
  0x31   : > { %p1011_p12 = pnand %p1010_p11, %p1004_p8 }
  0x33   : > { %1014 = shalt.err (!%p1011_p12)
}
  0x34   : > { %s1193_s21 = smov 128   ;;  %s1194_s22 = smov 8  }
  0x35   : > { %s1573_s4 = sld [smem:[#allocation31_spill]]  ;;  %s1026_s9 = scalar_lea.vmem %s211_s19, 256 }
  0x36   : > { %p1027_p13 = scmp.ne.s32.totalorder %s211_s19, %s1026_s9  ;;  %p1034_p4 = scmp.lt.s32.totalorder %s211_s19, %s211_s19 }
  0x37   : > { %p1035_p9 = scmp.lt.s32.totalorder %s1026_s9, %s1026_s9 }
  0x38   : > { %p1029_p0 = pnand %p1027_p13, %p965_p7 }
  0x39   : > { %p1036_p8 = por %p1035_p9, %p1034_p4 }
  0x3a   : > { %p1030_p2 = pneg %p1029_p0 }
  0x3b   : > { %871 = dma.hbm_to_vmem [thread:$0]  (!%p1287_p6), %s1573_s4, 256, %s224_s12, [#allocation12], %s1193_s21, %s1193_s21, %s1194_s22  }
  0x3c   : > { %p1037_p10 = pnand %p1036_p8, %p1030_p2 }
  0x3e   : > { %1040 = shalt.err (!%p1037_p10)
}
  0x3f   : > { %s1574_s3 = sld [smem:[#allocation30_spill]]  ;;  %s1195_s12 = smov [#allocation13]  }
  0x40   : > { %s236_s14 = sshll.u32 %s1195_s12, 4  ;;  %s237_s14 = int_to_ptr.vmem [resolvable:$true] %s236_s14 }
  0x41   : > { %s1052_s15 = scalar_lea.vmem %s237_s14, 256  ;;  %p1060_p0 = scmp.lt.s32.totalorder %s237_s14, %s237_s14 }
  0x42   : > { %p1053_p11 = scmp.ne.s32.totalorder %s237_s14, %s1052_s15  ;;  %p1061_p4 = scmp.lt.s32.totalorder %s1052_s15, %s1052_s15 }
  0x44   : > { %p1055_p12 = pnand %p1053_p11, %p965_p7  ;;  %p1062_p2 = por %p1061_p4, %p1060_p0 }
  0x45   : > { %868 = dma.hbm_to_vmem [thread:$0]  (!%p1287_p6), %s1574_s3, 256, %s211_s19, [#allocation9], %s1193_s21, %s1193_s21, %s1194_s22  }
  0x46   : > { %p1056_p13 = pneg %p1055_p12 }
  0x48   : > { %p1063_p9 = pnand %p1062_p2, %p1056_p13 }
  0x4a   : > { %1066 = shalt.err (!%p1063_p9)
}
  0x4b   : > { %s1575_s5 = sld [smem:[#allocation32_spill]]  ;;  %s759_s18 = sadd.s32 4294967294, %s1185_s0  }
  0x4c   : > { %s40_s19 = sadd.s32 1, %s1181_s28  ;;  %s49_s10 = sadd.s32 1, %s1173_s26 }
  0x4d   : > { %p42_p7 = scmp.ge.s32.totalorder %s40_s19, 2  ;;  %p56_p8 = scmp.ne.s32.totalorder %s1173_s26, %s1169_s25 }
  0x4e   : > { %p57_p10 = scmp.eq.s32.totalorder %s1185_s0, 0  ;;  %p62_p12 = scmp.ne.s32.totalorder %s1169_s25, %s1165_s24 }
  0x4f   : > { %s1599_s19 = smov (%p42_p7, %s40_s19), 0  ;;  %p178_p2 = scmp.eq.s32.totalorder %s759_s18, 1 }
  0x50   : > { %1576 = sst [smem:[#allocation25_spill]] %s1599_s19  ;;  %p1333_p11 = por %p57_p10, %p56_p8 }
  0x51   : > { %874 = dma.hbm_to_vmem [thread:$0]  (!%p1287_p6), %s1575_s5, 256, %s237_s14, [#allocation12], %s1193_s21, %s1193_s21, %s1194_s22  }
  0x52   : > { %s44_s21 = ssub.s32 %s1181_s28, %s1599_s19  ;;  %p172_p6 = scmp.eq.s32.totalorder %s758_s29, 1 }
  0x53   : > { %p47_p13 = scmp.eq.s32.totalorder %s44_s21, 0  ;;  %p1345_p0 = por %p1273_p1, %p62_p12 }
  0x54   : > { %p1349_p4 = por %p172_p6, %p56_p8  ;;  %p1356_p9 = por %p178_p2, %p62_p12 }
  0x55   : > { %s1354_s8 = scalar_select %p47_p13, %s1173_s26, %s49_s10  }
  0x56   : > { %s1581_s9 = scalar_select %p1356_p9, 1, 0 }
  0x57   : > { %1580 = sst [smem:[#allocation26_spill]] %s1354_s8  ;;  %p887_p7 = scmp.lt.s32.totalorder %s1185_s0, 2 }
  0x58   : > { %1582 = sst [smem:[#allocation27_spill]] %s1581_s9  ;;  %s250_s11 = sand.u32 1, %s1173_s26  }
  0x59   : > { %s767_s29 = sshll.u32 %s1181_s28, 7  ;;  %s766_s13 = sshll.u32 %s250_s11, 3 }
  0x5a   : > { %s1583_s1 = sld [smem:[#allocation28_spill]]  ;;  %s254_s16 = scalar_lea.vmem [#allocation5], %s766_s13 }
  0x5b   : > { %s262_s17 = sshll.u32 %s254_s16, 4  ;;  %p1368_p8 = pnand %p887_p7, %p1333_p11  ;;  %s263_s17 = int_to_ptr.vmem [resolvable:$true] %s262_s17 }
  0x5c   : > { %s251_s18 = scalar_lea.sflag [#allocation6], %s250_s11  ;;  %s1080_s10 = scalar_lea.vmem %s263_s17, 128 }
  0x5d   : > { %p1069_p10 = pneg %p1368_p8  ;;  %p1081_p12 = scmp.ne.s32.totalorder %s263_s17, %s1080_s10 }
  0x5e   : > { %s1196_s2 = smov [#allocation5]  }
  0x5f   : > { %p1083_p6 = pnand %p1081_p12, %p1069_p10  ;;  %s1085_s3 = sshll.u32 %s1196_s2, 4  ;;  %s1086_s3 = int_to_ptr.vmem [resolvable:$false] %s1085_s3 }
  0x60   : > { %s260_s15 = scalar_lea.hbm %s1583_s1, %s767_s29  ;;  %s1087_s29 = scalar_lea.vmem %s1086_s3, 256 }
  0x61   : > { %p1084_p13 = pneg %p1083_p6  ;;  %p1088_p2 = scmp.lt.s32.totalorder %s263_s17, %s1086_s3 }
  0x62   : > { %p1089_p5 = scmp.lt.s32.totalorder %s1087_s29, %s1080_s10 }
  0x64   : > { %p1090_p9 = por %p1089_p5, %p1088_p2 }
  0x66   : > { %p1091_p11 = pnand %p1090_p9, %p1084_p13 }
  0x68   : > { %1094 = shalt.err (!%p1091_p11)
}
  0x69   : > { %878 = dma.hbm_to_vmem [thread:$0]  (!%p1368_p8), %s260_s15, 128, %s263_s17, %s251_s18  }
  0x6a   : > { %271 = sbr.rel (%p1278_p3) target bundleno = 338 (0x152), region = 40  ;;  %s1379_s20 = sand.u32 (!%p1278_p3), 1, %s1169_s25  }
  0x6b   : > { %s1548_s2 = sshll.u32 (!%p1278_p3), %s1379_s20, 3  ;;  %s274_s11 = scalar_lea.sflag (!%p1278_p3), [#allocation6], %s1379_s20 }
  0x6c   : > { %s1385_s3 = scalar_lea.vmem (!%p1278_p3), [#allocation5], %s1548_s2 }
  0x6f   : > { %1148 = dma.done.wait (%p1345_p0), %s274_s11, 128  }
  0x70   : > { %1150 = vsyncadd (%p1345_p0), %s274_s11, 4294967168 }
  0x71   : > { %1152 = dma.done.wait (%p1273_p1), [#allocation9], 448  }
  0x72   : > { %1154 = vsyncadd (%p1273_p1), [#allocation9], 4294966848 }
  0x73   : > { %1156 = dma.done.wait (%p1273_p1), [#allocation12], 512  }
  0x74   : > { %1158 = vsyncadd (%p1273_p1), [#allocation12], 4294966784  ;;  %s1400_s7 = sshll.u32 %s1177_s27, 3  ;;  %v1197_v0 = vmov 0.0   ;;  %vm521_vm0 = vcmask 1040384   ;;  %vm1198_vm1 = vmmov 0  }
  0x75   : > { %834 = vmatprep.subr.bf16.mxu0 %v1197_v0  ;;  %s1403_s22 = sld [smem:[#allocation4 + %s1400_s7]]  ;;  %s326_s13 = sshra.s32 %s1400_s7, 7  ;;  %838 = vmatprep.mubr.msk.bf16.mxu0 %vm1198_vm1, %v1197_v0  ;;  %vm523_vm2 = vcmask 1041408   ;;  %v1199_v1 = vmov 65535   ;;  %v954_v6 = vld [vmem:[#allocation8] sm:$0xff]   ;;  %v536_v7 = vld [vmem:[%s1385_s3] sm:$0xff] }
  0x76   : > { %s799_s12 = sshll.u32 %s326_s13, 7  ;;  %s331_s14 = sand.u32 127, %s1400_s7  ;;  %v555_v2 = vsel %vm521_vm0, 4294967295, %v1199_v1  ;;  %v953_v4 = vld [vmem:[#allocation8 + $0x8] ss:$0 sps:$4 sm:$0x33]   ;;  %v537_v9 = vpack.c.bf16 %v536_v7, %v536_v7 }
  0x77   : > { %s800_s15 = sadd.s32 128, %s799_s12  ;;  %s802_s30 = sadd.s32 256, %s799_s12  ;;  %v556_v3 = vsel %vm523_vm2, %v555_v2, 0  ;;  %vm551_vm3 = vcmask 154624   ;;  %vm525_vm4 = vcmask 1042432   ;;  %vm527_vm5 = vcmask 1043456  }
  0x78   : > { %s332_s16 = sadd.s32 %s800_s15, %s331_s14  ;;  %s336_s17 = sadd.s32 %s802_s30, %s331_s14  ;;  %v558_v5 = vand.u32 %v953_v4, %v556_v3  ;;  %vm529_vm6 = vcmask 1044480   ;;  %vm531_vm7 = vcmask 1045504   ;;  %vm533_vm8 = vcmask 1046528  }
  0x79   : > { %s1407_s21 = sld [smem:[#allocation4 + %s332_s16]]  ;;  %s346_s18 = sadd.s32 1, %s1400_s7 }
  0x7a   : > { %s1411_s10 = sld [smem:[#allocation4 + %s336_s17]]  ;;  %s348_s29 = sshra.s32 %s346_s18, 7  ;;  %835 = vmatpush3.bf16.msra.mxu0 %v558_v5 }
  0x7b   : > { %s347_s11 = sld [smem:[#allocation4 + %s346_s18]]  ;;  %s803_s13 = sshll.u32 %s348_s29, 7  ;;  %836 = vmatprep.subr.bf16.mxu0 %v1197_v0 }
  0x7c   : > { %s353_s2 = sand.u32 127, %s346_s18  ;;  %s804_s12 = sadd.s32 128, %s803_s13 }
  0x7d   : > { %s806_s15 = sadd.s32 256, %s803_s13  ;;  %s354_s14 = sadd.s32 %s804_s12, %s353_s2 }
  0x7e   : > { %s358_s30 = sadd.s32 %s806_s15, %s353_s2  ;;  %s355_s16 = sld [smem:[#allocation4 + %s354_s14]]  ;;  %837 = vmatpush3.bf16.msra.mxu0 %v954_v6 }
  0x7f   : > { %s359_s1 = sld [smem:[#allocation4 + %s358_s30]]  ;;  %s368_s4 = sadd.s32 2, %s1400_s7 }
  0x80   : > { %s1416_s17 = sld [smem:[#allocation4 + %s368_s4]]  ;;  %s370_s29 = sshra.s32 %s368_s4, 7 }
  0x81   : > { %s807_s18 = sshll.u32 %s370_s29, 7  ;;  %s375_s5 = sand.u32 127, %s368_s4  ;;  %839 = vmatmul.mubr.msk.bf16.vlgmr.msra.gmra.mxu0 %vm551_vm3, %v537_v9 }
  0x82   : > { %s360_s19 = scalar_lea.vmem [#allocation10], %s347_s11  ;;  %s808_s13 = sadd.s32 128, %s807_s18 }
  0x83   : > { %v361_v8 = vld [vmem:[%s360_s19] sm:$0x1]  ;;  %s810_s12 = sadd.s32 256, %s807_s18  ;;  %s338_s2 = scalar_lea.vmem [#allocation10], %s1403_s22 }
  0x84   : > { %v339_v10 = vld [vmem:[%s338_s2] sm:$0x1]  ;;  %s376_s15 = sadd.s32 %s808_s13, %s375_s5  ;;  %s340_s3 = scalar_lea.vmem [#allocation11], %s1407_s21 }
  0x85   : > { %v341_v11 = vld [vmem:[%s340_s3] sm:$0x1]  ;;  %s362_s14 = scalar_lea.vmem [#allocation11], %s355_s16  ;;  %s377_s30 = sld [smem:[#allocation4 + %s376_s15]] }
  0x86   : > { %v363_v12 = vld [vmem:[%s362_s14] sm:$0x1]  ;;  %s365_s29 = scalar_lea.vmem [#allocation13], %s359_s1  ;;  %s380_s4 = sadd.s32 %s810_s12, %s375_s5  ;;  %v342_v15 = vadd.f32 %v341_v11, %v339_v10 }
  0x87   : > { %v364_v13 = vadd.f32 %v363_v12, %v361_v8  ;;  %v366_v14 = vld [vmem:[%s365_s29] sm:$0x1]  ;;  %s381_s19 = sld [smem:[#allocation4 + %s380_s4]]  ;;  %s343_s22 = scalar_lea.vmem [#allocation13], %s1411_s10 }
  0x88   : > { %v344_v17 = vld [vmem:[%s343_s22] sm:$0x1]  ;;  %s382_s11 = scalar_lea.vmem [#allocation10], %s1416_s17  ;;  %s390_s1 = sadd.s32 3, %s1400_s7 }
  0x89   : > { %v367_v16 = vadd.f32 %v366_v14, %v364_v13  ;;  %v383_v18 = vld [vmem:[%s382_s11] sm:$0x1]  ;;  %v345_v19 = vadd.f32 %v344_v17, %v342_v15  ;;  %s392_s5 = sshra.s32 %s390_s1, 7  ;;  %s397_s17 = sand.u32 127, %s390_s1 }
  0x8a   : > { %s811_s10 = sshll.u32 %s392_s5, 7  ;;  %s412_s12 = sadd.s32 4, %s1400_s7 }
  0x8b   : > { %s384_s18 = scalar_lea.vmem [#allocation11], %s377_s30  ;;  %v501_v21 = vrot.slane %v367_v16, 7  ;;  %s812_s16 = sadd.s32 128, %s811_s10 }
  0x8c   : > { %v385_v20 = vld [vmem:[%s384_s18] sm:$0x1]  ;;  %s398_s13 = sadd.s32 %s812_s16, %s397_s17  ;;  %s814_s2 = sadd.s32 256, %s811_s10 }
  0x8d   : > { %v386_v22 = vadd.f32 %v385_v20, %v383_v18  ;;  %s387_s21 = scalar_lea.vmem [#allocation13], %s381_s19  ;;  %v522_v25 = vsel %vm521_vm0, %v345_v19, %v501_v21  ;;  %s1428_s15 = sld [smem:[#allocation4 + %s390_s1]] }
  0x8e   : > { %v388_v23 = vld [vmem:[%s387_s21] sm:$0x1]  ;;  %s1430_s3 = sld [smem:[#allocation4 + %s398_s13]]  ;;  %s414_s14 = sshra.s32 %s412_s12, 7 }
  0x8f   : > { %v389_v24 = vadd.f32 %v388_v23, %v386_v22  ;;  %s402_s30 = sadd.s32 %s814_s2, %s397_s17  ;;  %s434_s29 = sadd.s32 5, %s1400_s7 }
  0x90   : > { %s815_s4 = sshll.u32 %s414_s14, 7  ;;  %s1433_s19 = sld [smem:[#allocation4 + %s402_s30]] }
  0x91   : > { %v504_v26 = vrot.slane %v389_v24, 6  ;;  %s419_s22 = sand.u32 127, %s412_s12  ;;  %s436_s11 = sshra.s32 %s434_s29, 7 }
  0x92   : > { %s816_s18 = sadd.s32 128, %s815_s4  ;;  %s1436_s21 = sadd.s32 6, %s1400_s7 }
  0x93   : > { %v1424_v27 = vsel %vm523_vm2, %v522_v25, %v504_v26  ;;  %s1438_s5 = sld [smem:[#allocation4 + %s412_s12]]  ;;  %s819_s1 = sshll.u32 %s436_s11, 7 }
  0x94   : > { %s420_s10 = sadd.s32 %s816_s18, %s419_s22  ;;  %s458_s16 = sshra.s32 %s1436_s21, 7 }
  0x95   : > { %s818_s13 = sadd.s32 256, %s815_s4  ;;  %s1442_s28 = sadd.s32 7, %s1400_s7 }
  0x96   : > { %s820_s17 = sadd.s32 128, %s819_s1  ;;  %s441_s2 = sand.u32 127, %s434_s29 }
  0x97   : > { %s1444_s14 = sld [smem:[#allocation4 + %s420_s10]]  ;;  %s823_s30 = sshll.u32 %s458_s16, 7 }
  0x98   : > { %s424_s8 = sadd.s32 %s818_s13, %s419_s22  ;;  %s480_s26 = sshra.s32 %s1442_s28, 7 }
  0x99   : > { %s442_s25 = sadd.s32 %s820_s17, %s441_s2  ;;  %s822_s0 = sadd.s32 256, %s819_s1 }
  0x9a   : > { %s824_s12 = sadd.s32 128, %s823_s30  ;;  %s463_s9 = sand.u32 127, %s1436_s21 }
  0x9b   : > { %s1448_s11 = sld [smem:[#allocation4 + %s434_s29]]  ;;  %s827_s4 = sshll.u32 %s480_s26, 7 }
  0x9c   : > { %s1450_s7 = sld [smem:[#allocation4 + %s424_s8]]  ;;  %s446_s18 = sadd.s32 %s822_s0, %s441_s2 }
  0x9d   : > { %s1452_s24 = sld [smem:[#allocation4 + %s442_s25]]  ;;  %s464_s10 = sadd.s32 %s824_s12, %s463_s9 }
  0x9e   : > { %s828_s16 = sadd.s32 128, %s827_s4  ;;  %s485_s22 = sand.u32 127, %s1442_s28 }
  0x9f   : > { %s1455_s13 = sld [smem:[#allocation4 + %s446_s18]]  ;;  %s826_s1 = sadd.s32 256, %s823_s30 }
  0xa0   : > { %s1458_s17 = sld [smem:[#allocation4 + %s1436_s21]]  ;;  %s486_s26 = sadd.s32 %s828_s16, %s485_s22 }
  0xa1   : > { %s1460_s29 = sld [smem:[#allocation4 + %s464_s10]]  ;;  %s468_s8 = sadd.s32 %s826_s1, %s463_s9 }
  0xa2   : > { %s830_s6 = sadd.s32 256, %s827_s4  ;;  %s404_s0 = scalar_lea.vmem [#allocation10], %s1428_s15 }
  0xa3   : > { %v405_v28 = vld [vmem:[%s404_s0] sm:$0x1]  ;;  %s406_s25 = scalar_lea.vmem [#allocation11], %s1430_s3  ;;  %s1465_s2 = sld [smem:[#allocation4 + %s1442_s28]] }
  0xa4   : > { %v407_v29 = vld [vmem:[%s406_s25] sm:$0x1]  ;;  %s1467_s12 = sld [smem:[#allocation4 + %s486_s26]]  ;;  %s490_s21 = sadd.s32 %s830_s6, %s485_s22 }
  0xa5   : > { %s1469_s30 = sld [smem:[#allocation4 + %s468_s8]]  ;;  %v408_v30 = vadd.f32 %v407_v29, %v405_v28  ;;  %s426_s18 = scalar_lea.vmem [#allocation10], %s1438_s5 }
  0xa6   : > { %v427_v31 = vld [vmem:[%s426_s18] sm:$0x1]  ;;  %s428_s9 = scalar_lea.vmem [#allocation11], %s1444_s14  ;;  %s409_s15 = scalar_lea.vmem [#allocation13], %s1433_s19 }
  0xa7   : > { %v429_v32 = vld [vmem:[%s428_s9] sm:$0x1]  ;;  %s1474_s3 = sld [smem:[#allocation4 + %s490_s21]]  ;;  %s448_s28 = scalar_lea.vmem [#allocation10], %s1448_s11 }
  0xa8   : > { %v410_v33 = vld [vmem:[%s409_s15] sm:$0x1]  ;;  %v430_v34 = vadd.f32 %v429_v32, %v427_v31  ;;  %s450_s4 = scalar_lea.vmem [#allocation11], %s1452_s24  ;;  %s431_s6 = scalar_lea.vmem [#allocation13], %s1450_s7 }
  0xa9   : > { %v449_v35 = vld [vmem:[%s448_s28] sm:$0x1]  ;;  %v411_v37 = vadd.f32 %v410_v33, %v408_v30  ;;  %s470_s5 = scalar_lea.vmem [#allocation10], %s1458_s17  ;;  %s472_s14 = scalar_lea.vmem [#allocation11], %s1460_s29 }
  0xaa   : > { %v451_v36 = vld [vmem:[%s450_s4] sm:$0x1]  ;;  %s453_s19 = scalar_lea.vmem [#allocation13], %s1455_s13  ;;  %s492_s24 = scalar_lea.vmem [#allocation10], %s1465_s2 }
  0xab   : > { %v432_v38 = vld [vmem:[%s431_s6] sm:$0x1]  ;;  %v452_v39 = vadd.f32 %v451_v36, %v449_v35  ;;  %v507_v44 = vrot.slane %v411_v37, 5  ;;  %s494_s11 = scalar_lea.vmem [#allocation11], %s1467_s12  ;;  %s475_s7 = scalar_lea.vmem [#allocation13], %s1469_s30 }
  0xac   : > { %v471_v40 = vld [vmem:[%s470_s5] sm:$0x1]  ;;  %v433_v42 = vadd.f32 %v432_v38, %v430_v34  ;;  %s796_s16 = sshll.u32 %s1177_s27, 7  ;;  %s1585_s22 = sshll.u32 %s1379_s20, 3 }
  0xad   : > { %v473_v41 = vld [vmem:[%s472_s14] sm:$0x1]  ;;  %v526_v51 = vsel %vm525_vm4, %v1424_v27, %v507_v44  ;;  %s497_s10 = scalar_lea.vmem [#allocation13], %s1474_s3  ;;  %s319_s13 = scalar_lea.vmem [#allocation14], %s1585_s22 }
  0xae   : > { %v454_v43 = vld [vmem:[%s453_s19] sm:$0x1]  ;;  %v474_v45 = vadd.f32 %v473_v41, %v471_v40  ;;  %v510_v50 = vrot.slane %v433_v42, 4  ;;  %s616_s1 = sshll.u32 %s319_s13, 4  ;;  %s1586_s26 = sld [smem:[#allocation33_spill]]  ;;  %s1495_s1 = int_to_ptr.vmem [resolvable:$true] %s616_s1 }
  0xaf   : > { %v493_v46 = vld [vmem:[%s492_s24] sm:$0x1]  ;;  %v455_v48 = vadd.f32 %v454_v43, %v452_v39  ;;  %s602_s25 = scalar_lea.sflag [#allocation7], %s1379_s20  ;;  %s1095_s27 = scalar_lea.vmem %s1495_s1, 128 }
  0xb0   : > { %v495_v47 = vld [vmem:[%s494_s11] sm:$0x1]  ;;  %v528_v56 = vsel %vm527_vm5, %v526_v51, %v510_v50  ;;  %p1096_p1 = scmp.ne.s32.totalorder %s1495_s1, %s1095_s27  ;;  %s1200_s2 = smov [#allocation14]  }
  0xb1   : > { %v476_v49 = vld [vmem:[%s475_s7] sm:$0x1]  ;;  %v496_v52 = vadd.f32 %v495_v47, %v493_v46  ;;  %v513_v55 = vrot.slane %v455_v48, 3  ;;  %s1099_s12 = sshll.u32 %s1200_s2, 4  ;;  %s1100_s12 = int_to_ptr.vmem [resolvable:$false] %s1099_s12 }
  0xb2   : > { %v477_v53 = vadd.f32 %v476_v49, %v474_v45  ;;  %v498_v54 = vld [vmem:[%s497_s10] sm:$0x1]  ;;  %p1097_p3 = pnand %p1096_p1, %p1349_p4  ;;  %s1101_s30 = scalar_lea.vmem %s1100_s12, 256 }
  0xb3   : > { %v499_v57 = vadd.f32 %v498_v54, %v496_v52  ;;  %v530_v59 = vsel %vm529_vm6, %v528_v56, %v513_v55  ;;  %p1102_p0 = scmp.lt.s32.totalorder %s1495_s1, %s1100_s12  ;;  %p1103_p9 = scmp.lt.s32.totalorder %s1101_s30, %s1095_s27 }
  0xb4   : > { %v516_v58 = vrot.slane %v477_v53, 2  ;;  %s1587_s8 = smov %s1586_s26  ;;  %s1493_s0 = scalar_lea.hbm %s1586_s26, %s796_s16 }
  0xb5   : > { %v519_v60 = vrot.slane %v499_v57, 1  ;;  %p1098_p5 = pneg %p1097_p3  ;;  %p1104_p7 = por %p1103_p9, %p1102_p0 }
  0xb6   : > { %v532_v61 = vsel %vm531_vm7, %v530_v59, %v516_v58 }
  0xb7   : > { %v534_v62 = vsel %vm533_vm8, %v532_v61, %v519_v60  ;;  %p1105_p8 = pnand %p1104_p7, %p1098_p5 }
 0x141   : > { %v594_v63 = vpop.f32.mrf.mxu0 }
 0x142   : > { %v595_v0 = vadd.f32 %v594_v63, %v534_v62 }
 0x143   : > { %v840_v1 = vpop.f32.mrf.mxu0 }
 0x144   : > { %600 = vst [vmem:[%s319_s13] sm:$0xff] %v595_v0 }
 0x145   : > { %v597_v2 = vpop.f32.mrf.mxu0 }
 0x146   : > { %1108 = shalt.err (!%p1105_p8)
}
 0x147   : > { %s1109_s21 = scalar_lea.hbm %s1493_s0, 128  ;;  %s1113_s9 = scalar_lea.hbm %s1587_s8, 256 }
 0x148   : > { %p1110_p10 = scmp.ne.s32.totalorder %s1493_s0, %s1109_s21  ;;  %p1114_p13 = scmp.lt.s32.totalorder %s1493_s0, %s1587_s8 }
 0x149   : > { %p1115_p2 = scmp.lt.s32.totalorder %s1113_s9, %s1109_s21 }
 0x14a   : > { %p1111_p12 = pnand %p1110_p10, %p1349_p4 }
 0x14b   : > { %p1116_p11 = por %p1115_p2, %p1114_p13 }
 0x14c   : > { %p1112_p6 = pneg %p1111_p12 }
 0x14e   : > { %p1117_p1 = pnand %p1116_p11, %p1112_p6 }
 0x150   : > { %1120 = shalt.err (!%p1117_p1)
}
 0x151   : > { %860 = dma.vmem_to_hbm [thread:$0]  (%p1349_p4), %s1495_s1, 128, %s1493_s0, %s602_s25   ;;  %v841_v3 = vpop.f32.mrf.mxu0 }
 0x152 PF: > { %s1588_s28 = sld [smem:[#allocation20_spill]] }
 0x153   : > { %s1589_s4 = sld [smem:[#allocation27_spill]] }
 0x154   : > { %s1590_s6 = sld [smem:[#allocation24_spill]] }
 0x158   : > { %s628_s5 = sand.u32 1, %s1588_s28  }
 0x159   : > { %p1591_p3 = scmp.ne.s32.totalorder %s1589_s4, 0  ;;  %s629_s14 = scalar_lea.sflag [#allocation7], %s628_s5 }
 0x15a   : > { %p1592_p5 = scmp.ge.s32.totalorder %s1590_s6, 2 }
 0x15c   : > { %p880_p0 = pnand %p1592_p5, %p1591_p3 }
 0x15e   : > { %p881_p9 = pneg %p880_p0 }
 0x160   : > { %1160 = dma.done.wait (%p881_p9), %s629_s14, 128  }
 0x161   : > { %1162 = vsyncadd (%p881_p9), %s629_s14, 4294967168  ;;  %s28_s0 = sadd.s32 1, %s1590_s6   ;;  %s1593_s24 = sld [smem:[#allocation21_spill]] }
 0x162   : > { %p25_p7 = scmp.ge.s32.totalorder %s28_s0, 4   ;;  %s1594_s25 = sld [smem:[#allocation22_spill]] }
 0x163   : > { %s1595_s26 = sld [smem:[#allocation26_spill]] }
 0x164   : > { %s1596_s27 = sld [smem:[#allocation23_spill]]  ;;  %27 = sbr.rel (!%p25_p7) target bundleno = 19 (0x13), region = 125 }
 0x165   : > { %s1597_s28 = sld [smem:[#allocation25_spill]] }
 0x169   :  { %634 = vsyncpa [#allocation6], 1 }
 0x16a   :  { %636 = vsyncpa [#allocation6 + $0x1], 1 }
 0x16b   :  { %637 = vsyncpa [#allocation9], 1 }
 0x16c   :  { %638 = vsyncpa [#allocation12], 1 }
 0x16d   :  { %639 = vsyncpa [#allocation7], 1 }
 0x16e   :  { %641 = vsyncpa [#allocation7 + $0x1], 1 }

</bundles_post_ra>
